<compile_context>
chip_gen: v7x
topology: tpu7x:2x2x1
jax: 0.10.0
libtpu: 0.0.40
codegen_flags: <defaults>
</compile_context>

<pallas_src>
import jax
import jax.numpy as jnp
from jax.experimental import pallas as pl
from jax.experimental.pallas import tpu as pltpu


def _space2plane_kernel(intrin_ref, coord_ref, depth_ref, uv_ref):
    # intrin_ref: (4*N,) f32 in SMEM -> [fx, fy, cx, cy] per batch (flattened)
    # coord_ref : (3, R, 128) VMEM tile (native dtype)
    # depth_ref : (1, R, 128) VMEM tile (native dtype)
    # uv_ref    : (2, R, 128) VMEM tile (output dtype)
    n = pl.program_id(0)
    fx = intrin_ref[4 * n + 0]
    fy = intrin_ref[4 * n + 1]
    cx = intrin_ref[4 * n + 2]
    cy = intrin_ref[4 * n + 3]

    # Dense (R, 128) loads; upcast to f32 for compute only (no bf16 VPU on v5e).
    x = coord_ref[0, :, :].astype(jnp.float32)
    y = coord_ref[1, :, :].astype(jnp.float32)
    z = coord_ref[2, :, :].astype(jnp.float32)
    d = depth_ref[0, :, :].astype(jnp.float32)

    inv_d = 1.0 / d  # exact divide: approx reciprocal * fx~500 can exceed tol
    # Rows of K @ p with K = [[fx,0,cx],[0,fy,cy],[0,0,1]], then perspective div.
    u = (fx * x + cx * z) * inv_d
    v = (fy * y + cy * z) * inv_d

    # Direct per-channel stores (no sublane concatenate / shuffle).
    uv_ref[0, :, :] = u.astype(uv_ref.dtype)
    uv_ref[1, :, :] = v.astype(uv_ref.dtype)


def _sublane_multiple(*dtypes):
    """Packing-aware sublane multiple: 8 for 32-bit, 16 for bf16, 32 for 8-bit."""
    m = 8
    for dt in dtypes:
        m = max(m, 32 // max(1, jnp.dtype(dt).itemsize))
    return m


def _pick_block_rows(total_rows, batch, sub_mult, max_rows=1024):
    """Fixed near-optimal row block: a multiple of the dtype packing factor,
    capped at max_rows, and small enough that the grid exposes >= ~4 steps
    (for v7x's two TensorCores) whenever the input is large enough."""
    if total_rows <= sub_mult:
        return total_rows  # full-extent block: always legal, no padding needed
    target_steps = 4
    min_row_blocks = max(1, -(-target_steps // max(batch, 1)))  # ceil(4/N)
    desired = -(-total_rows // min_row_blocks)                  # rows per block
    desired = -(-desired // sub_mult) * sub_mult                # round up
    cap = max(sub_mult, (max_rows // sub_mult) * sub_mult)
    return max(sub_mult, min(desired, cap))


def space2plane(depth, coord_3d, camera_params, *, max_block_rows=1024):
    """depth: (N,1,H,W), coord_3d: (N,3,H,W), camera_params['intrinsic'][k]: (N,)."""
    N, C3, H, W = coord_3d.shape
    assert C3 == 3
    HW = H * W

    out_dtype = depth.dtype
    sub_mult = _sublane_multiple(coord_3d.dtype, depth.dtype, out_dtype)

    total_rows = -(-HW // 128)                     # ceil(HW / 128)
    block_rows = _pick_block_rows(total_rows, N, sub_mult, max_block_rows)
    num_row_blocks = -(-total_rows // block_rows)  # ceil
    padded_hw = num_row_blocks * block_rows * 128
    pad = padded_hw - HW

    intr = camera_params["intrinsic"]
    # Flattened 1-D SMEM scalar-prefetch array: [fx0,fy0,cx0,cy0, fx1,...]
    intrin = jnp.stack(
        [intr["fx"], intr["fy"], intr["cx"], intr["cy"]], axis=-1
    ).astype(jnp.float32).reshape(4 * N)

    # Contiguous reshapes; pad the flat spatial axis (tail block masking done
    # by slicing the output afterwards).  Keep native dtype through the DMA.
    coord_flat = coord_3d.reshape(N, 3, HW)
    depth_flat = depth.reshape(N, 1, HW)
    if pad:
        coord_flat = jnp.pad(coord_flat, ((0, 0), (0, 0), (0, pad)))
        depth_flat = jnp.pad(depth_flat, ((0, 0), (0, 0), (0, pad)),
                             constant_values=1)  # avoid div-by-0 in dead lanes
    rows = num_row_blocks * block_rows
    coord_r = coord_flat.reshape(N, 3, rows, 128)
    depth_r = depth_flat.reshape(N, 1, rows, 128)

    # Explicit VMEM budget: double-buffered (3ch coord + 1ch depth + 2ch out)
    # per step plus headroom; clamp into a range safe on v5e/v6e/v7x.
    isz_c = jnp.dtype(coord_3d.dtype).itemsize
    isz_d = jnp.dtype(depth.dtype).itemsize
    isz_o = jnp.dtype(out_dtype).itemsize
    bytes_per_step = block_rows * 128 * (3 * isz_c + 1 * isz_d + 2 * isz_o)
    vmem_limit = int(min(max(2 * bytes_per_step + (8 << 20), 16 << 20), 32 << 20))

    cost = pl.CostEstimate(
        flops=7 * N * HW,
        transcendentals=N * HW,  # the per-pixel reciprocal
        bytes_accessed=N * HW * (3 * isz_c + 1 * isz_d + 2 * isz_o),
    )

    uv_r = pl.pallas_call(
        _space2plane_kernel,
        out_shape=jax.ShapeDtypeStruct((N, 2, rows, 128), out_dtype),
        grid_spec=pltpu.PrefetchScalarGridSpec(
            num_scalar_prefetch=1,
            grid=(N, num_row_blocks),
            in_specs=[
                pl.BlockSpec((None, 3, block_rows, 128),
                             lambda n, t, intrin: (n, 0, t, 0)),
                pl.BlockSpec((None, 1, block_rows, 128),
                             lambda n, t, intrin: (n, 0, t, 0)),
            ],
            out_specs=pl.BlockSpec((None, 2, block_rows, 128),
                                   lambda n, t, intrin: (n, 0, t, 0)),
        ),
        compiler_params=pltpu.CompilerParams(
            dimension_semantics=("parallel", "parallel"),
            vmem_limit_bytes=vmem_limit,
        ),
        cost_estimate=cost,
    )(intrin, coord_r, depth_r)

    uv_flat = uv_r.reshape(N, 2, padded_hw)
    if pad:
        uv_flat = uv_flat[:, :, :HW]
    return uv_flat.reshape(N, 2, H, W)


def _space2plane_ref(depth, coord_3d, camera_params):
    N, _, H, W = coord_3d.shape
    intr = camera_params["intrinsic"]
    K = jnp.zeros((N, 3, 3), jnp.float32)
    K = K.at[:, 0, 0].set(intr["fx"]).at[:, 1, 1].set(intr["fy"])
    K = K.at[:, 0, 2].set(intr["cx"]).at[:, 1, 2].set(intr["cy"])
    K = K.at[:, 2, 2].set(1.0)
    p = coord_3d.reshape(N, 3, -1).astype(jnp.float32)
    proj = jnp.einsum("nij,njk->nik", K, p)
    uv = proj[:, :2, :] / depth.reshape(N, 1, -1).astype(jnp.float32)
    return uv.reshape(N, 2, H, W).astype(depth.dtype)


if __name__ == "__main__":
    key = jax.random.PRNGKey(0)
    N, H, W = 2, 16, 16
    k_depth, k_xy = jax.random.split(key)

    depth = jax.random.uniform(k_depth, (N, 1, H, W), jnp.float32, 1.0, 5.0)
    xy = jax.random.normal(k_xy, (N, 2, H, W), jnp.float32)
    # Camera-frame 3-D points whose Z channel equals the depth map.
    coord_3d = jnp.concatenate([xy * depth, depth], axis=1)        # (N,3,H,W)

    camera_params = {
        "intrinsic": {
            "fx": jnp.full((N,), 500.0, jnp.float32),
            "fy": jnp.full((N,), 510.0, jnp.float32),
            "cx": jnp.full((N,), 8.0, jnp.float32),
            "cy": jnp.full((N,), 7.5, jnp.float32),
        }
    }

    uv = space2plane(depth, coord_3d, camera_params)
    jax.block_until_ready(uv)

    uv_ref = _space2plane_ref(depth, coord_3d, camera_params)
    assert uv.shape == (N, 2, H, W)
    assert jnp.allclose(uv, uv_ref, rtol=1e-5, atol=1e-4), "mismatch vs reference"

    print("KERNEL_OK")
</pallas_src>

<mosaic_0001>
module attributes {stable_mosaic.version = 11 : i64} {
  func.func @_space2plane_kernel(%arg0: i32, %arg1: i32, %arg2: memref<8xf32, #tpu.memory_space<smem>>, %arg3: memref<1x3x2x128xf32, #tpu.memory_space<vmem>>, %arg4: memref<1x1x2x128xf32, #tpu.memory_space<vmem>>, %arg5: memref<1x2x2x128xf32, #tpu.memory_space<vmem>>) attributes {dimension_semantics = [#tpu.dimension_semantics<parallel>, #tpu.dimension_semantics<parallel>], iteration_bounds = array<i64: 2, 1>, scalar_prefetch = 1 : i64, scratch_operands = 0 : i64, tpu.core_type = #tpu.core_type<tc>, window_params = [{transform_indices = @transform_0, window_bounds = array<i64: 1, 3, 2, 128>}, {transform_indices = @transform_1, window_bounds = array<i64: 1, 1, 2, 128>}, {transform_indices = @transform_2, window_bounds = array<i64: 1, 2, 2, 128>}]} {
    %c4_i32 = arith.constant 4 : i32
    %0 = arith.muli %c4_i32, %arg0 : i32
    %c0_i32 = arith.constant 0 : i32
    %1 = arith.addi %0, %c0_i32 : i32
    %2 = arith.index_cast %1 : i32 to index
    %3 = memref.load %arg2[%2] : memref<8xf32, #tpu.memory_space<smem>>
    %c4_i32_0 = arith.constant 4 : i32
    %4 = arith.muli %c4_i32_0, %arg0 : i32
    %c1_i32 = arith.constant 1 : i32
    %5 = arith.addi %4, %c1_i32 : i32
    %6 = arith.index_cast %5 : i32 to index
    %7 = memref.load %arg2[%6] : memref<8xf32, #tpu.memory_space<smem>>
    %c4_i32_1 = arith.constant 4 : i32
    %8 = arith.muli %c4_i32_1, %arg0 : i32
    %c2_i32 = arith.constant 2 : i32
    %9 = arith.addi %8, %c2_i32 : i32
    %10 = arith.index_cast %9 : i32 to index
    %11 = memref.load %arg2[%10] : memref<8xf32, #tpu.memory_space<smem>>
    %c4_i32_2 = arith.constant 4 : i32
    %12 = arith.muli %c4_i32_2, %arg0 : i32
    %c3_i32 = arith.constant 3 : i32
    %13 = arith.addi %12, %c3_i32 : i32
    %14 = arith.index_cast %13 : i32 to index
    %15 = memref.load %arg2[%14] : memref<8xf32, #tpu.memory_space<smem>>
    %c0 = arith.constant 0 : index
    %c0_3 = arith.constant 0 : index
    %c0_4 = arith.constant 0 : index
    %c0_5 = arith.constant 0 : index
    %16 = vector.load %arg3[%c0, %c0_3, %c0_4, %c0_5] : memref<1x3x2x128xf32, #tpu.memory_space<vmem>>, vector<1x1x2x128xf32>
    %17 = vector.shape_cast %16 : vector<1x1x2x128xf32> to vector<2x128xf32>
    %c0_6 = arith.constant 0 : index
    %c1 = arith.constant 1 : index
    %c0_7 = arith.constant 0 : index
    %c0_8 = arith.constant 0 : index
    %18 = vector.load %arg3[%c0_6, %c1, %c0_7, %c0_8] : memref<1x3x2x128xf32, #tpu.memory_space<vmem>>, vector<1x1x2x128xf32>
    %19 = vector.shape_cast %18 : vector<1x1x2x128xf32> to vector<2x128xf32>
    %c0_9 = arith.constant 0 : index
    %c2 = arith.constant 2 : index
    %c0_10 = arith.constant 0 : index
    %c0_11 = arith.constant 0 : index
    %20 = vector.load %arg3[%c0_9, %c2, %c0_10, %c0_11] : memref<1x3x2x128xf32, #tpu.memory_space<vmem>>, vector<1x1x2x128xf32>
    %21 = vector.shape_cast %20 : vector<1x1x2x128xf32> to vector<2x128xf32>
    %c0_12 = arith.constant 0 : index
    %c0_13 = arith.constant 0 : index
    %c0_14 = arith.constant 0 : index
    %c0_15 = arith.constant 0 : index
    %22 = vector.load %arg4[%c0_12, %c0_13, %c0_14, %c0_15] : memref<1x1x2x128xf32, #tpu.memory_space<vmem>>, vector<1x1x2x128xf32>
    %23 = vector.shape_cast %22 : vector<1x1x2x128xf32> to vector<2x128xf32>
    %cst = arith.constant 1.000000e+00 : f32
    %24 = vector.broadcast %cst : f32 to vector<2x128xf32>
    %25 = arith.divf %24, %23 : vector<2x128xf32>
    %26 = vector.broadcast %3 : f32 to vector<2x128xf32>
    %27 = arith.mulf %26, %17 : vector<2x128xf32>
    %28 = vector.broadcast %11 : f32 to vector<2x128xf32>
    %29 = arith.mulf %28, %21 : vector<2x128xf32>
    %30 = arith.addf %27, %29 : vector<2x128xf32>
    %31 = arith.mulf %30, %25 : vector<2x128xf32>
    %32 = vector.broadcast %7 : f32 to vector<2x128xf32>
    %33 = arith.mulf %32, %19 : vector<2x128xf32>
    %34 = vector.broadcast %15 : f32 to vector<2x128xf32>
    %35 = arith.mulf %34, %21 : vector<2x128xf32>
    %36 = arith.addf %33, %35 : vector<2x128xf32>
    %37 = arith.mulf %36, %25 : vector<2x128xf32>
    %c0_16 = arith.constant 0 : index
    %c0_17 = arith.constant 0 : index
    %c0_18 = arith.constant 0 : index
    %c0_19 = arith.constant 0 : index
    %38 = vector.load %arg5[%c0_16, %c0_17, %c0_18, %c0_19] : memref<1x2x2x128xf32, #tpu.memory_space<vmem>>, vector<1x1x2x128xf32>
    %39 = vector.shape_cast %38 : vector<1x1x2x128xf32> to vector<2x128xf32>
    %40 = vector.shape_cast %31 : vector<2x128xf32> to vector<1x1x2x128xf32>
    tpu.vector_store %arg5[%c0_16, %c0_17, %c0_18, %c0_19], %40 {strides = array<i32>} : memref<1x2x2x128xf32, #tpu.memory_space<vmem>>, vector<1x1x2x128xf32>,
    %c0_20 = arith.constant 0 : index
    %c1_21 = arith.constant 1 : index
    %c0_22 = arith.constant 0 : index
    %c0_23 = arith.constant 0 : index
    %41 = vector.load %arg5[%c0_20, %c1_21, %c0_22, %c0_23] : memref<1x2x2x128xf32, #tpu.memory_space<vmem>>, vector<1x1x2x128xf32>
    %42 = vector.shape_cast %41 : vector<1x1x2x128xf32> to vector<2x128xf32>
    %43 = vector.shape_cast %37 : vector<2x128xf32> to vector<1x1x2x128xf32>
    tpu.vector_store %arg5[%c0_20, %c1_21, %c0_22, %c0_23], %43 {strides = array<i32>} : memref<1x2x2x128xf32, #tpu.memory_space<vmem>>, vector<1x1x2x128xf32>,
    return
  }
  func.func @transform_0(%arg0: i32, %arg1: i32, %arg2: memref<8xf32, #tpu.memory_space<smem>>) -> (i32, i32, i32, i32) {
    %c0_i32 = arith.constant 0 : i32
    %c0_i32_0 = arith.constant 0 : i32
    %c0_i32_1 = arith.constant 0 : i32
    return %arg0, %c0_i32, %arg1, %c0_i32_0 : i32, i32, i32, i32
  }
  func.func @transform_1(%arg0: i32, %arg1: i32, %arg2: memref<8xf32, #tpu.memory_space<smem>>) -> (i32, i32, i32, i32) {
    %c0_i32 = arith.constant 0 : i32
    %c0_i32_0 = arith.constant 0 : i32
    %c0_i32_1 = arith.constant 0 : i32
    return %arg0, %c0_i32, %arg1, %c0_i32_0 : i32, i32, i32, i32
  }
  func.func @transform_2(%arg0: i32, %arg1: i32, %arg2: memref<8xf32, #tpu.memory_space<smem>>) -> (i32, i32, i32, i32) {
    %c0_i32 = arith.constant 0 : i32
    %c0_i32_0 = arith.constant 0 : i32
    %c0_i32_1 = arith.constant 0 : i32
    return %arg0, %c0_i32, %arg1, %c0_i32_0 : i32, i32, i32, i32
  }
}

</mosaic_0001>

<bundles_post_ra>
// kernel: tpu_custom_call.1
= control target key start
LH: loop header
LB: loop body
LE: loop exit
PB: predicated region body
PF: predicated region fallthrough
CT: control target
= control target key end

     0   :  { %s795_s0 = inlined_call_operand.hbm [shape: f32[8], index: 0, kind: input, shape index: {}]   ;;  %s796_s1 = inlined_call_operand.hbm [shape: f32[2,3,2,128], index: 1, kind: input, shape index: {}]   ;;  %s797_s2 = inlined_call_operand.vmem [shape: f32[2,1,2,128], index: 2, kind: input, shape index: {}]   ;;  %s798_s3 = inlined_call_operand.hbm [shape: f32[2,2,2,128], index: 3, kind: output, shape index: {}]  }
   0x1   :  { %s448_s14 = scalar_lea.hbm %s795_s0, 16 }
   0x2   :  { %p449_p0 = scmp.ne.s32.totalorder %s795_s0, %s448_s14  ;;  %p452_p1 = scmp.lt.u32.totalorder %s448_s14, %s795_s0 }
   0x4   :  { %p454_p2 = pnand %p452_p1, %p449_p0 }
   0x6   :  { %457 = shalt.err (!%p454_p2)  }
   0x7   :  { %s574_s19 = smov [#allocation3]  }
   0x8   :  { %9 = dma.hbm_to_smem %s795_s0, 16, %s574_s19, [#allocation2] }
   0x9   :  { %540 = dma.done.wait [#allocation2], 16 }
   0xa   :  { %541 = vsyncadd [#allocation2], 4294967280 }
   0xb   :  { %11 = sfence }
   0xc   :  { %12 = vsyncpa [#allocation5], 0 }
   0xd   :  { %14 = vsyncpa [#allocation5 + $0x1], 0 }
   0xe   :  { %15 = vsyncpa [#allocation6], 0 }
   0xf   :  { %17 = vsyncpa [#allocation6 + $0x1], 0  ;;  %s613_s22 = smov 0   ;;  %s615_s23 = smov 0  }
  0x10   :  { %s617_s24 = smov 0   ;;  %s619_s25 = smov 0  }
  0x11   :  { %s621_s26 = smov 0   ;;  %s623_s27 = smov 0  }
  0x12 LB: > { %s358_s0 = sadd.s32 4294967295, %s572_s27   ;;  %s359_s28 = sadd.s32 4294967294, %s572_s27   ;;  %s572_s27 = sphi %s623_s27, %s23_s27   ;;  %s568_s26 = sphi %s621_s26, %s813_s26   ;;  %s564_s25 = sphi %s619_s25, %s812_s25   ;;  %s560_s24 = sphi %s617_s24, %s811_s24   ;;  %s556_s23 = sphi %s615_s23, %s810_s23   ;;  %s552_s22 = sphi %s613_s22, %s809_s22  }
  0x13   : > { %s35_s29 = sadd.s32 1, %s568_s26  ;;  %s44_s30 = sadd.s32 1, %s560_s24 }
  0x14   : > { %p37_p3 = scmp.ge.s32.totalorder %s35_s29, 2  ;;  %p51_p4 = scmp.ne.s32.totalorder %s560_s24, %s556_s23 }
  0x15   : > { %p52_p5 = scmp.eq.s32.totalorder %s572_s27, 0  ;;  %p57_p6 = scmp.ne.s32.totalorder %s556_s23, %s552_s22 }
  0x16   : > { %s815_s29 = smov (%p37_p3, %s35_s29), 0  ;;  %p58_p8 = scmp.eq.s32.totalorder %s358_s0, 0 }
  0x17   : > { %p654_p7 = por %p52_p5, %p51_p4  ;;  %s39_s5 = ssub.s32 %s568_s26, %s815_s29 }
  0x18   : > { %p111_p9 = scmp.eq.s32.totalorder %s358_s0, 1  ;;  %p42_p10 = scmp.eq.s32.totalorder %s39_s5, 0 }
  0x19   : > { %p660_p11 = por %p58_p8, %p57_p6  ;;  %p117_p13 = scmp.eq.s32.totalorder %s359_s28, 1 }
  0x1a   : > { %p664_p12 = por %p111_p9, %p51_p4  ;;  %p391_p2 = scmp.lt.s32.totalorder %s572_s27, 2 }
  0x1b   : > { %s669_s8 = scalar_select %p42_p10, %s560_s24, %s44_s30  }
  0x1c   : > { %s802_s7 = scalar_select %p664_p12, 1, 0 }
  0x1d   : > { %p671_p0 = por %p117_p13, %p57_p6  ;;  %s137_s10 = sand.u32 1, %s560_s24  }
  0x1e   : > { %s376_s11 = smul.u32 6, %s137_s10  ;;  %p681_p3 = pnand %p391_p2, %p654_p7 }
  0x1f   : > { %s803_s9 = scalar_select %p671_p0, 1, 0 }
  0x20   : > { %s377_s12 = smul.u32 96, %s568_s26  ;;  %s141_s17 = scalar_lea.vmem [#allocation4], %s376_s11 }
  0x21   : > { %s149_s18 = sshll.u32 %s141_s17, 4  ;;  %s693_s19 = scalar_lea.sflag [#allocation5], %s137_s10  ;;  %s690_s18 = int_to_ptr.vmem [resolvable:$true] %s149_s18 }
  0x22   : > { %s688_s16 = scalar_lea.hbm %s796_s1, %s377_s12  ;;  %p460_p6 = pneg %p681_p3 }
  0x23   : > { %s458_s20 = scalar_lea.hbm %s688_s16, 96  ;;  %s463_s28 = scalar_lea.hbm %s796_s1, 192 }
  0x24   : > { %p459_p5 = scmp.ne.s32.totalorder %s688_s16, %s458_s20  ;;  %p464_p9 = scmp.lt.u32.totalorder %s688_s16, %s796_s1 }
  0x25   : > { %p465_p10 = scmp.lt.u32.totalorder %s463_s28, %s458_s20  ;;  %p467_p2 = scmp.lt.u32.totalorder %s458_s20, %s688_s16 }
  0x26   : > { %p461_p7 = pnand %p460_p6, %p459_p5 }
  0x27   : > { %p466_p13 = por %p465_p10, %p464_p9 }
  0x28   : > { %p462_p8 = pneg %p461_p7 }
  0x29   : > { %p468_p1 = por %p467_p2, %p466_p13 }
  0x2b   : > { %p469_p4 = pnand %p468_p1, %p462_p8 }
  0x2d   : > { %472 = shalt.err (!%p469_p4)
}
  0x2e   : > { %s473_s5 = scalar_lea.vmem %s690_s18, 96  ;;  %s575_s10 = smov [#allocation4]  }
  0x2f   : > { %p474_p5 = scmp.ne.s32.totalorder %s690_s18, %s473_s5  ;;  %s478_s11 = sshll.u32 %s575_s10, 4  ;;  %s479_s11 = int_to_ptr.vmem [resolvable:$false] %s478_s11 }
  0x30   : > { %s480_s12 = scalar_lea.vmem %s479_s11, 192  ;;  %p481_p12 = scmp.lt.s32.totalorder %s690_s18, %s479_s11 }
  0x31   : > { %p476_p7 = pnand %p474_p5, %p460_p6  ;;  %p482_p9 = scmp.lt.s32.totalorder %s480_s12, %s473_s5 }
  0x33   : > { %p477_p0 = pneg %p476_p7  ;;  %p483_p10 = por %p482_p9, %p481_p12 }
  0x35   : > { %p484_p13 = pnand %p483_p10, %p477_p0 }
  0x37   : > { %487 = shalt.err (!%p484_p13)
}
  0x38   : > { %s576_s14 = smov 32   ;;  %s577_s15 = smov 2  }
  0x39   : > { %386 = dma.hbm_to_vmem [thread:$0]  (!%p681_p3), %s688_s16, 96, %s690_s18, %s693_s19, %s576_s14, %s576_s14, %s577_s15  }
  0x3a   : > { %p167_p1 = scmp.lt.s32.totalorder %s572_s27, 3  ;;  %p805_p4 = scmp.ge.s32.totalorder %s572_s27, 1 }
  0x3c   : > { %p168_p6 = pnand %p805_p4, %p167_p1 }
  0x3d   : > { %s725_s17 = sand.u32 (!%p168_p6), 1, %s556_s23  }
  0x3e   : > { %171 = sbr.rel (%p168_p6) target bundleno = 105 (0x69), region = 28  ;;  %s174_s21 = scalar_lea.sflag (!%p168_p6), [#allocation5], %s725_s17 }
  0x3f   : > { %s378_s20 = smul.u32 (!%p168_p6), 6, %s725_s17 }
  0x41   : > { %s177_s0 = scalar_lea.vmem (!%p168_p6), [#allocation4], %s378_s20 }
  0x45   : > { %543 = dma.done.wait (%p660_p11), %s174_s21, 96  }
  0x46   : > { %545 = vsyncadd (%p660_p11), %s174_s21, 4294967200  ;;  %p205_p12 = scmp.lt.s32.totalorder %s564_s25, 1  ;;  %s366_s13 = sshll.u32 %s564_s25, 2  ;;  %v220_v1 = vld [vmem:[%s177_s0] sm:$0x3] }
  0x47   : > { %s213_s18 = sld [smem:[#allocation3 + %s366_s13]]  ;;  %s216_s19 = sadd.s32 2, %s366_s13  ;;  %v368_v2 = vld [vmem:[%s177_s0 + $0x4] sm:$0x3]  ;;  %v367_v7 = vld [vmem:[%s177_s0 + $0x2] sm:$0x3] }
  0x48   : > { %s206_s16 = scalar_select %p205_p12, %s564_s25, 1 }
  0x49   : > { %s217_s30 = sld [smem:[#allocation3 + %s216_s19]]  ;;  %s214_s11 = sadd.s32 1, %s366_s13 }
  0x4a   : > { %s365_s28 = sshll.u32 %s206_s16, 1  ;;  %s215_s6 = sld [smem:[#allocation3 + %s214_s11]] }
  0x4b   : > { %s211_s10 = scalar_lea.vmem %s797_s2, %s365_s28  ;;  %s218_s12 = sadd.s32 3, %s366_s13 }
  0x4c   : > { %v225_v0 = vld [vmem:[%s211_s10] sm:$0x3]  ;;  %s364_s14 = sshll.u32 %s725_s17, 2  ;;  %s219_s15 = sld [smem:[#allocation3 + %s218_s12]] }
  0x4d   : > { %446 = vrcp.f32 %v225_v0  ;;  %v228_v3 = vstv %s213_s18  ;;  %s204_s20 = scalar_lea.vmem [#allocation7], %s364_s14  ;;  %s375_s16 = sshll.u32 %s564_s25, 6 }
  0x4e   : > { %v229_v5 = vmul.f32 %v228_v3, %v220_v1  ;;  %s258_s21 = sshll.u32 %s204_s20, 4  ;;  %s746_s18 = scalar_lea.hbm %s798_s3, %s375_s16  ;;  %s741_s21 = int_to_ptr.vmem [resolvable:$true] %s258_s21 }
  0x4f   : > { %v230_v4 = vstv %s217_s30  ;;  %s244_s19 = scalar_lea.sflag [#allocation6], %s725_s17  ;;  %s488_s28 = scalar_lea.vmem %s741_s21, 64 }
  0x50   : > { %v231_v6 = vmul.f32 %v368_v2, %v230_v4  ;;  %v234_v8 = vstv %s215_s6  ;;  %p489_p11 = scmp.ne.s32.totalorder %s741_s21, %s488_s28  ;;  %p806_p0 = scmp.ne.s32.totalorder %s802_s7, 0 }
  0x51   : > { %v235_v10 = vmul.f32 %v367_v7, %v234_v8  ;;  %s578_s25 = smov [#allocation7]  }
  0x52   : > { %v232_v9 = vadd.f32 %v231_v6, %v229_v5  ;;  %v236_v11 = vstv %s219_s15  ;;  %p490_p3 = pnand %p489_p11, %p806_p0  ;;  %s492_s30 = sshll.u32 %s578_s25, 4  ;;  %s493_s30 = int_to_ptr.vmem [resolvable:$false] %s492_s30 }
  0x53   : > { %v237_v12 = vmul.f32 %v368_v2, %v236_v11  ;;  %s494_s4 = scalar_lea.vmem %s493_s30, 128  ;;  %p495_p2 = scmp.lt.s32.totalorder %s741_s21, %s493_s30 }
  0x54   : > { %p491_p8 = pneg %p490_p3  ;;  %p496_p5 = scmp.lt.s32.totalorder %s494_s4, %s488_s28 }
  0x55   : > { %v238_v14 = vadd.f32 %v237_v12, %v235_v10 }
  0x56   : > { %p497_p7 = por %p496_p5, %p495_p2 }
  0x57   : > { %v447_v13 = vpop.eup %446 }
  0x58   : > { %v233_v15 = vmul.f32 %v447_v13, %v232_v9  ;;  %v239_v16 = vmul.f32 %v447_v13, %v238_v14  ;;  %p498_p9 = pnand %p497_p7, %p491_p8 }
  0x5a   : > { %240 = vst [vmem:[%s204_s20] sm:$0x3] %v233_v15  ;;  %369 = vst [vmem:[%s204_s20 + $0x2] sm:$0x3] %v239_v16 }
  0x5b   : > { %501 = shalt.err (!%p498_p9)
}
  0x5c   : > { %s502_s5 = scalar_lea.hbm %s746_s18, 64  ;;  %s506_s6 = scalar_lea.hbm %s798_s3, 128 }
  0x5d   : > { %p503_p10 = scmp.ne.s32.totalorder %s746_s18, %s502_s5  ;;  %p507_p4 = scmp.lt.u32.totalorder %s746_s18, %s798_s3 }
  0x5e   : > { %p508_p6 = scmp.lt.u32.totalorder %s506_s6, %s502_s5  ;;  %p510_p11 = scmp.lt.u32.totalorder %s502_s5, %s746_s18 }
  0x5f   : > { %p504_p13 = pnand %p503_p10, %p806_p0 }
  0x60   : > { %p509_p12 = por %p508_p6, %p507_p4 }
  0x61   : > { %p505_p1 = pneg %p504_p13 }
  0x62   : > { %p511_p3 = por %p510_p11, %p509_p12 }
  0x64   : > { %p512_p8 = pnand %p511_p3, %p505_p1 }
  0x66   : > { %515 = shalt.err (!%p512_p8)
}
  0x67   : > { %s579_s15 = smov 32   ;;  %s580_s20 = smov 2  }
  0x68   : > { %381 = dma.vmem_to_hbm [thread:$0]  (%p806_p0), %s741_s21, 64, %s746_s18, %s244_s19, %s579_s15, %s579_s15, %s580_s20  }
  0x69 PF: > { %s273_s16 = sand.u32 1, %s552_s22   ;;  %p807_p2 = scmp.ne.s32.totalorder %s803_s9, 0 }
  0x6a   : > { %p808_p5 = scmp.ge.s32.totalorder %s572_s27, 2  ;;  %s274_s0 = scalar_lea.sflag [#allocation6], %s273_s16 }
  0x6c   : > { %p388_p7 = pnand %p808_p5, %p807_p2 }
  0x6e   : > { %547 = dma.done.wait (!%p388_p7), %s274_s0, 64  }
  0x6f   : > { %549 = vsyncadd (!%p388_p7), %s274_s0, 4294967232  ;;  %s23_s27 = sadd.s32 1, %s572_s27   ;;  %s809_s22 = smov %s556_s23 }
  0x70   : > { %p20_p9 = scmp.ge.s32.totalorder %s23_s27, 4   ;;  %s810_s23 = smov %s560_s24 }
  0x71   : > { %s811_s24 = smov %s669_s8  ;;  %s812_s25 = smov %s568_s26 }
  0x72   : > { %s813_s26 = smov %s815_s29  ;;  %22 = sbr.rel (!%p20_p9) target bundleno = 18 (0x12), region = 79 }
  0x79   :  { %279 = vsyncpa [#allocation5], 1 }
  0x7a   :  { %281 = vsyncpa [#allocation5 + $0x1], 1 }
  0x7b   :  { %282 = vsyncpa [#allocation6], 1 }
  0x7c   :  { %284 = vsyncpa [#allocation6 + $0x1], 1 }

</bundles_post_ra>
